<compile_context>
chip_gen: v5e
topology: v5e:2x2
jax: 0.10.0
libtpu: 0.0.40
codegen_flags: <defaults>
</compile_context>

<pallas_src>
import itertools
import numpy as np
import jax
import jax.numpy as jnp
from jax.experimental import pallas as pl
from jax.experimental.pallas import tpu as pltpu

# ---------------------------------------------------------------------------
# Deterministic JPEG / DiffJPEG constants (no checkpoint).
# ---------------------------------------------------------------------------
Y_TABLE = np.array(
    [[16, 11, 10, 16, 24, 40, 51, 61],
     [12, 12, 14, 19, 26, 58, 60, 55],
     [14, 13, 16, 24, 40, 57, 69, 56],
     [14, 17, 22, 29, 51, 87, 80, 62],
     [18, 22, 37, 56, 68, 109, 103, 77],
     [24, 35, 55, 64, 81, 104, 113, 92],
     [49, 64, 78, 87, 103, 121, 120, 101],
     [72, 92, 95, 98, 112, 100, 103, 99]], dtype=np.float32).T

C_TABLE = np.full((8, 8), 99.0, dtype=np.float32)
C_TABLE[:4, :4] = np.array([[17, 18, 24, 47], [18, 21, 26, 66],
                            [24, 26, 56, 99], [47, 66, 99, 99]],
                           dtype=np.float32).T

_RGB2YCC = np.array([[0.299, 0.587, 0.114],
                     [-0.168736, -0.331264, 0.5],
                     [0.5, -0.418688, -0.081312]], dtype=np.float32)
# Fold the torch module's `image * 255` into the conversion coefficients.
_KY = [float(v) for v in _RGB2YCC[0] * 255.0]
_KCB = [float(v) for v in _RGB2YCC[1] * 255.0]
_KCR = [float(v) for v in _RGB2YCC[2] * 255.0]


# ---------------------------------------------------------------------------
# Kernel 1: RGB -> YCbCr (x255 folded) + 2x2 chroma average-pool subsampling.
# ---------------------------------------------------------------------------
def _color_subsample_kernel(r_ref, g_ref, b_ref, pw_ref, y_ref, cbcr_ref):
    r = r_ref[...]
    g = g_ref[...]
    b = b_ref[...]
    # Luma (shift = 0).
    y_ref[...] = _KY[0] * r + _KY[1] * g + _KY[2] * b
    # Full-resolution chroma; +128 is added after pooling (pooling is linear).
    cbf = _KCB[0] * r + _KCB[1] * g + _KCB[2] * b
    crf = _KCR[0] * r + _KCR[1] * g + _KCR[2] * b
    th, w = cbf.shape
    # Vertical pair-sum on the VPU via a reshape-sum.
    cbp = cbf.reshape(th // 2, 2, w)
    crp = crf.reshape(th // 2, 2, w)
    cbv = cbp[:, 0, :] + cbp[:, 1, :]
    crv = crp[:, 0, :] + crp[:, 1, :]
    # Horizontal pair-sum + /4 via a small (W, W/2) lane-compaction matmul.
    pw = pw_ref[...]
    cbcr_ref[0] = jnp.dot(cbv, pw, preferred_element_type=jnp.float32) + 128.0
    cbcr_ref[1] = jnp.dot(crv, pw, preferred_element_type=jnp.float32) + 128.0


def _pick_tile_h(h):
    for t in (128, 64, 32, 16):
        if h % t == 0:
            return t
    return h


def rgb_to_ycc_subsample(image):
    """image: (B, 3, H, W) float32 in [0,1] ->
         y: (B, H, W), cbcr: (2, B, H/2, W/2)   (values already scaled to 0..255)."""
    B, C, H, W = image.shape
    assert C == 3 and H % 16 == 0 and W % 16 == 0
    tile_h = _pick_tile_h(H)

    # 0.25-valued selection matrix: horizontal pair-sum and the /4 of avg-pool.
    pw = np.zeros((W, W // 2), np.float32)
    pw[np.arange(W), np.arange(W) // 2] = 0.25

    y, cbcr = pl.pallas_call(
        _color_subsample_kernel,
        out_shape=(jax.ShapeDtypeStruct((B, H, W), jnp.float32),
                   jax.ShapeDtypeStruct((2, B, H // 2, W // 2), jnp.float32)),
        grid_spec=pltpu.PrefetchScalarGridSpec(
            num_scalar_prefetch=0,
            grid=(B, H // tile_h),
            in_specs=[
                # Same HBM array three times; the index_map selects the channel,
                # so no XLA channel-slice copies are materialized.
                pl.BlockSpec((None, None, tile_h, W), lambda i, j: (i, 0, j, 0)),
                pl.BlockSpec((None, None, tile_h, W), lambda i, j: (i, 1, j, 0)),
                pl.BlockSpec((None, None, tile_h, W), lambda i, j: (i, 2, j, 0)),
                pl.BlockSpec((W, W // 2), lambda i, j: (0, 0)),
            ],
            out_specs=[
                pl.BlockSpec((None, tile_h, W), lambda i, j: (i, j, 0)),
                pl.BlockSpec((2, None, tile_h // 2, W // 2),
                             lambda i, j: (0, i, j, 0)),
            ]),
        compiler_params=pltpu.CompilerParams(
            dimension_semantics=("parallel", "parallel")),
    )(image, image, image, jnp.asarray(pw))
    return y, cbcr


# ---------------------------------------------------------------------------
# Kernel 2: 8x8 DCT + quantization, 4 blocks packed per 256-lane row.
# ---------------------------------------------------------------------------
def _dct_quant_kernel(x_ref, d_ref, bias_ref, o_ref):
    # x: (TILE_M, 64*pack) rows of flattened 8x8 blocks (pack blocks per row).
    # d: (64*pack, 64*pack) block-diagonal DCT basis with outer scale and the
    #    1/(quant_table*factor) divide folded into each column.
    # bias: (1, 64*pack) = -128 * column-sums of d (folds the -128 level shift).
    o_ref[...] = jnp.round(
        jnp.dot(x_ref[...], d_ref[...], preferred_element_type=jnp.float32)
        + bias_ref[...])


def _dct_quant_matrices(table, factor, pack):
    d = np.zeros((8, 8, 8, 8), dtype=np.float32)
    for x, y, u, v in itertools.product(range(8), repeat=4):
        d[x, y, u, v] = (np.cos((2 * x + 1) * u * np.pi / 16) *
                         np.cos((2 * y + 1) * v * np.pi / 16))
    alpha = np.array([1.0 / np.sqrt(2)] + [1.0] * 7, dtype=np.float32)
    comb = (np.outer(alpha, alpha) * 0.25 / (table * factor)).reshape(1, 64)
    dc = (d.reshape(64, 64) * comb).astype(np.float32)
    lanes = 64 * pack
    dp = np.zeros((lanes, lanes), np.float32)
    for p in range(pack):
        dp[p * 64:(p + 1) * 64, p * 64:(p + 1) * 64] = dc
    bias = (-128.0 * dp.sum(axis=0, keepdims=True)).astype(np.float32)
    return dp, bias


def _pick_tile_m(m, target=1024):
    if m <= target:
        return m
    t = target - (target % 8)
    while t >= 8:
        if m % t == 0:
            return t
        t -= 8
    return m  # fallback: no tiling (only for pathological shapes)


def block_dct_quantize(planes, table, factor=1.0):
    """planes: (N, Hc, Wc) -> (N, Hc*Wc/64, 8, 8) quantized DCT coefficients."""
    N, Hc, Wc = planes.shape
    assert Hc % 8 == 0 and Wc % 8 == 0
    nb = (Hc // 8) * (Wc // 8)
    M = N * nb
    pack = 4 if M % 4 == 0 else (2 if M % 2 == 0 else 1)
    lanes = 64 * pack
    Mp = M // pack

    # TODO(synk): fold this 8x8 block-split relayout into the DCT kernel itself
    # (kept as a single XLA transpose for lowering robustness).
    rows = planes.reshape(N, Hc // 8, 8, Wc // 8, 8)
    rows = rows.transpose(0, 1, 3, 2, 4).reshape(Mp, lanes)

    dp, bias = _dct_quant_matrices(table, float(factor), pack)
    tile_m = _pick_tile_m(Mp)

    out = pl.pallas_call(
        _dct_quant_kernel,
        out_shape=jax.ShapeDtypeStruct((Mp, lanes), jnp.float32),
        grid_spec=pltpu.PrefetchScalarGridSpec(
            num_scalar_prefetch=0,
            grid=(Mp // tile_m,),
            in_specs=[pl.BlockSpec((tile_m, lanes), lambda i: (i, 0)),
                      pl.BlockSpec((lanes, lanes), lambda i: (0, 0)),
                      pl.BlockSpec((1, lanes), lambda i: (0, 0))],
            out_specs=pl.BlockSpec((tile_m, lanes), lambda i: (i, 0))),
        compiler_params=pltpu.CompilerParams(dimension_semantics=("parallel",)),
    )(rows, jnp.asarray(dp), jnp.asarray(bias))
    return out.reshape(N, nb, 8, 8)


# ---------------------------------------------------------------------------
# Full compress_jpeg forward.
# ---------------------------------------------------------------------------
def compress_jpeg(image, factor=1.0):
    """image: (B, 3, H, W) float32 in [0,1].
    Returns (y, cb, cr): (B, H*W/64, 8, 8), (B, H*W/256, 8, 8), (B, H*W/256, 8, 8)."""
    B, C, H, W = image.shape
    assert C == 3 and H % 16 == 0 and W % 16 == 0
    y_plane, cbcr = rgb_to_ycc_subsample(image)
    y_q = block_dct_quantize(y_plane, Y_TABLE, factor)
    # cb and cr share the same quant table -> one fused pallas_call over (2B,...).
    c_q = block_dct_quantize(cbcr.reshape(2 * B, H // 2, W // 2), C_TABLE, factor)
    cb_q, cr_q = c_q[:B], c_q[B:]
    return y_q, cb_q, cr_q


if __name__ == "__main__":
    key = jax.random.PRNGKey(0)
    B, H, W = 2, 16, 16
    image = jax.random.uniform(key, (B, 3, H, W), dtype=jnp.float32)

    y_q, cb_q, cr_q = compress_jpeg(image, factor=1.0)
    jax.block_until_ready((y_q, cb_q, cr_q))

    assert y_q.shape == (B, (H // 8) * (W // 8), 8, 8)
    assert cb_q.shape == (B, (H // 16) * (W // 16), 8, 8)
    assert cr_q.shape == (B, (H // 16) * (W // 16), 8, 8)
    print("KERNEL_OK")
</pallas_src>

<mosaic_0001>
module attributes {stable_mosaic.version = 11 : i64} {
  func.func @_color_subsample_kernel(%arg0: i32, %arg1: i32, %arg2: memref<1x1x16x16xf32, #tpu.memory_space<vmem>>, %arg3: memref<1x1x16x16xf32, #tpu.memory_space<vmem>>, %arg4: memref<1x1x16x16xf32, #tpu.memory_space<vmem>>, %arg5: memref<16x8xf32, #tpu.memory_space<vmem>>, %arg6: memref<1x16x16xf32, #tpu.memory_space<vmem>>, %arg7: memref<2x1x8x8xf32, #tpu.memory_space<vmem>>) attributes {dimension_semantics = [#tpu.dimension_semantics<parallel>, #tpu.dimension_semantics<parallel>], iteration_bounds = array<i64: 2, 1>, scalar_prefetch = 0 : i64, scratch_operands = 0 : i64, tpu.core_type = #tpu.core_type<tc>, window_params = [{transform_indices = @transform_0, window_bounds = array<i64: 1, 1, 16, 16>}, {transform_indices = @transform_1, window_bounds = array<i64: 1, 1, 16, 16>}, {transform_indices = @transform_2, window_bounds = array<i64: 1, 1, 16, 16>}, {pipeline_mode = #tpu.pipeline_mode<synchronous>, transform_indices = @transform_3, window_bounds = array<i64: 16, 8>}, {transform_indices = @transform_4, window_bounds = array<i64: 1, 16, 16>}, {transform_indices = @transform_5, window_bounds = array<i64: 2, 1, 8, 8>}]} {
    %c0 = arith.constant 0 : index
    %c0_0 = arith.constant 0 : index
    %c0_1 = arith.constant 0 : index
    %c0_2 = arith.constant 0 : index
    %0 = vector.load %arg2[%c0, %c0_0, %c0_1, %c0_2] : memref<1x1x16x16xf32, #tpu.memory_space<vmem>>, vector<1x1x16x16xf32>
    %1 = vector.shape_cast %0 : vector<1x1x16x16xf32> to vector<16x16xf32>
    %c0_3 = arith.constant 0 : index
    %c0_4 = arith.constant 0 : index
    %c0_5 = arith.constant 0 : index
    %c0_6 = arith.constant 0 : index
    %2 = vector.load %arg3[%c0_3, %c0_4, %c0_5, %c0_6] : memref<1x1x16x16xf32, #tpu.memory_space<vmem>>, vector<1x1x16x16xf32>
    %3 = vector.shape_cast %2 : vector<1x1x16x16xf32> to vector<16x16xf32>
    %c0_7 = arith.constant 0 : index
    %c0_8 = arith.constant 0 : index
    %c0_9 = arith.constant 0 : index
    %c0_10 = arith.constant 0 : index
    %4 = vector.load %arg4[%c0_7, %c0_8, %c0_9, %c0_10] : memref<1x1x16x16xf32, #tpu.memory_space<vmem>>, vector<1x1x16x16xf32>
    %5 = vector.shape_cast %4 : vector<1x1x16x16xf32> to vector<16x16xf32>
    %cst = arith.constant 76.2449951 : f32
    %6 = vector.broadcast %cst : f32 to vector<16x16xf32>
    %7 = arith.mulf %6, %1 : vector<16x16xf32>
    %cst_11 = arith.constant 1.496850e+02 : f32
    %8 = vector.broadcast %cst_11 : f32 to vector<16x16xf32>
    %9 = arith.mulf %8, %3 : vector<16x16xf32>
    %10 = arith.addf %7, %9 : vector<16x16xf32>
    %cst_12 = arith.constant 2.907000e+01 : f32
    %11 = vector.broadcast %cst_12 : f32 to vector<16x16xf32>
    %12 = arith.mulf %11, %5 : vector<16x16xf32>
    %13 = arith.addf %10, %12 : vector<16x16xf32>
    %c0_13 = arith.constant 0 : index
    %c0_14 = arith.constant 0 : index
    %c0_15 = arith.constant 0 : index
    %14 = vector.load %arg6[%c0_13, %c0_14, %c0_15] : memref<1x16x16xf32, #tpu.memory_space<vmem>>, vector<1x16x16xf32>
    %15 = vector.shape_cast %14 : vector<1x16x16xf32> to vector<16x16xf32>
    %16 = vector.shape_cast %13 : vector<16x16xf32> to vector<1x16x16xf32>
    tpu.vector_store %arg6[%c0_13, %c0_14, %c0_15], %16 {strides = array<i32>} : memref<1x16x16xf32, #tpu.memory_space<vmem>>, vector<1x16x16xf32>,
    %cst_16 = arith.constant -43.0276794 : f32
    %17 = vector.broadcast %cst_16 : f32 to vector<16x16xf32>
    %18 = arith.mulf %17, %1 : vector<16x16xf32>
    %cst_17 = arith.constant -84.4723205 : f32
    %19 = vector.broadcast %cst_17 : f32 to vector<16x16xf32>
    %20 = arith.mulf %19, %3 : vector<16x16xf32>
    %21 = arith.addf %18, %20 : vector<16x16xf32>
    %cst_18 = arith.constant 1.275000e+02 : f32
    %22 = vector.broadcast %cst_18 : f32 to vector<16x16xf32>
    %23 = arith.mulf %22, %5 : vector<16x16xf32>
    %24 = arith.addf %21, %23 : vector<16x16xf32>
    %cst_19 = arith.constant 1.275000e+02 : f32
    %25 = vector.broadcast %cst_19 : f32 to vector<16x16xf32>
    %26 = arith.mulf %25, %1 : vector<16x16xf32>
    %cst_20 = arith.constant -106.765442 : f32
    %27 = vector.broadcast %cst_20 : f32 to vector<16x16xf32>
    %28 = arith.mulf %27, %3 : vector<16x16xf32>
    %29 = arith.addf %26, %28 : vector<16x16xf32>
    %cst_21 = arith.constant -20.73456 : f32
    %30 = vector.broadcast %cst_21 : f32 to vector<16x16xf32>
    %31 = arith.mulf %30, %5 : vector<16x16xf32>
    %32 = arith.addf %29, %31 : vector<16x16xf32>
    %33 = vector.shape_cast %24 : vector<16x16xf32> to vector<8x2x16xf32>
    %34 = vector.shape_cast %32 : vector<16x16xf32> to vector<8x2x16xf32>
    %35 = vector.extract_strided_slice %33 {offsets = [0, 0, 0], sizes = [8, 1, 16], strides = [1, 1, 1]} : vector<8x2x16xf32> to vector<8x1x16xf32>
    %36 = vector.shape_cast %35 : vector<8x1x16xf32> to vector<8x16xf32>
    %37 = vector.extract_strided_slice %33 {offsets = [0, 1, 0], sizes = [8, 1, 16], strides = [1, 1, 1]} : vector<8x2x16xf32> to vector<8x1x16xf32>
    %38 = vector.shape_cast %37 : vector<8x1x16xf32> to vector<8x16xf32>
    %39 = arith.addf %36, %38 : vector<8x16xf32>
    %40 = vector.extract_strided_slice %34 {offsets = [0, 0, 0], sizes = [8, 1, 16], strides = [1, 1, 1]} : vector<8x2x16xf32> to vector<8x1x16xf32>
    %41 = vector.shape_cast %40 : vector<8x1x16xf32> to vector<8x16xf32>
    %42 = vector.extract_strided_slice %34 {offsets = [0, 1, 0], sizes = [8, 1, 16], strides = [1, 1, 1]} : vector<8x2x16xf32> to vector<8x1x16xf32>
    %43 = vector.shape_cast %42 : vector<8x1x16xf32> to vector<8x16xf32>
    %44 = arith.addf %41, %43 : vector<8x16xf32>
    %c0_22 = arith.constant 0 : index
    %c0_23 = arith.constant 0 : index
    %45 = vector.load %arg5[%c0_22, %c0_23] : memref<16x8xf32, #tpu.memory_space<vmem>>, vector<16x8xf32>
    %cst_24 = arith.constant dense<0.000000e+00> : vector<8x8xf32>
    %46 = tpu.matmul %39, %45, %cst_24 {dimension_numbers = #tpu.dot_dimension_numbers<[1], [0], [0], [1], [0, 0, 1, 1], [], []>} : vector<8x16xf32>, vector<16x8xf32>, vector<8x8xf32> -> vector<8x8xf32>
    %cst_25 = arith.constant 1.280000e+02 : f32
    %47 = vector.broadcast %cst_25 : f32 to vector<8x8xf32>
    %48 = arith.addf %46, %47 : vector<8x8xf32>
    %c0_26 = arith.constant 0 : index
    %c0_27 = arith.constant 0 : index
    %c0_28 = arith.constant 0 : index
    %c0_29 = arith.constant 0 : index
    %49 = vector.load %arg7[%c0_26, %c0_27, %c0_28, %c0_29] : memref<2x1x8x8xf32, #tpu.memory_space<vmem>>, vector<1x1x8x8xf32>
    %50 = vector.shape_cast %49 : vector<1x1x8x8xf32> to vector<8x8xf32>
    %51 = vector.shape_cast %48 : vector<8x8xf32> to vector<1x1x8x8xf32>
    tpu.vector_store %arg7[%c0_26, %c0_27, %c0_28, %c0_29], %51 {strides = array<i32>} : memref<2x1x8x8xf32, #tpu.memory_space<vmem>>, vector<1x1x8x8xf32>,
    %cst_30 = arith.constant dense<0.000000e+00> : vector<8x8xf32>
    %52 = tpu.matmul %44, %45, %cst_30 {dimension_numbers = #tpu.dot_dimension_numbers<[1], [0], [0], [1], [0, 0, 1, 1], [], []>} : vector<8x16xf32>, vector<16x8xf32>, vector<8x8xf32> -> vector<8x8xf32>
    %cst_31 = arith.constant 1.280000e+02 : f32
    %53 = vector.broadcast %cst_31 : f32 to vector<8x8xf32>
    %54 = arith.addf %52, %53 : vector<8x8xf32>
    %c1 = arith.constant 1 : index
    %c0_32 = arith.constant 0 : index
    %c0_33 = arith.constant 0 : index
    %c0_34 = arith.constant 0 : index
    %55 = vector.load %arg7[%c1, %c0_32, %c0_33, %c0_34] : memref<2x1x8x8xf32, #tpu.memory_space<vmem>>, vector<1x1x8x8xf32>
    %56 = vector.shape_cast %55 : vector<1x1x8x8xf32> to vector<8x8xf32>
    %57 = vector.shape_cast %54 : vector<8x8xf32> to vector<1x1x8x8xf32>
    tpu.vector_store %arg7[%c1, %c0_32, %c0_33, %c0_34], %57 {strides = array<i32>} : memref<2x1x8x8xf32, #tpu.memory_space<vmem>>, vector<1x1x8x8xf32>,
    return
  }
  func.func @transform_0(%arg0: i32, %arg1: i32) -> (i32, i32, i32, i32) {
    %c0_i32 = arith.constant 0 : i32
    %c0_i32_0 = arith.constant 0 : i32
    %c0_i32_1 = arith.constant 0 : i32
    return %arg0, %c0_i32, %arg1, %c0_i32_0 : i32, i32, i32, i32
  }
  func.func @transform_1(%arg0: i32, %arg1: i32) -> (i32, i32, i32, i32) {
    %c1_i32 = arith.constant 1 : i32
    %c0_i32 = arith.constant 0 : i32
    %c0_i32_0 = arith.constant 0 : i32
    return %arg0, %c1_i32, %arg1, %c0_i32 : i32, i32, i32, i32
  }
  func.func @transform_2(%arg0: i32, %arg1: i32) -> (i32, i32, i32, i32) {
    %c2_i32 = arith.constant 2 : i32
    %c0_i32 = arith.constant 0 : i32
    %c0_i32_0 = arith.constant 0 : i32
    return %arg0, %c2_i32, %arg1, %c0_i32 : i32, i32, i32, i32
  }
  func.func @transform_3(%arg0: i32, %arg1: i32) -> (i32, i32) {
    %c0_i32 = arith.constant 0 : i32
    %c0_i32_0 = arith.constant 0 : i32
    %c0_i32_1 = arith.constant 0 : i32
    return %c0_i32, %c0_i32_0 : i32, i32
  }
  func.func @transform_4(%arg0: i32, %arg1: i32) -> (i32, i32, i32) {
    %c0_i32 = arith.constant 0 : i32
    %c0_i32_0 = arith.constant 0 : i32
    return %arg0, %arg1, %c0_i32 : i32, i32, i32
  }
  func.func @transform_5(%arg0: i32, %arg1: i32) -> (i32, i32, i32, i32) {
    %c0_i32 = arith.constant 0 : i32
    %c0_i32_0 = arith.constant 0 : i32
    %c0_i32_1 = arith.constant 0 : i32
    return %c0_i32, %arg0, %arg1, %c0_i32_0 : i32, i32, i32, i32
  }
}

</mosaic_0001>

<bundles_post_ra>
// kernel: tpu_custom_call.1
= control target key start
LH: loop header
LB: loop body
LE: loop exit
PB: predicated region body
PF: predicated region fallthrough
CT: control target
= control target key end

     0   :  { %s1406_s0 = inlined_call_operand.hbm [shape: f32[2,3,16,16], index: 0, kind: input, shape index: {}]   ;;  %s1407_s1 = inlined_call_operand.hbm [shape: f32[2,3,16,16], index: 1, kind: input, shape index: {}]   ;;  %s1408_s2 = inlined_call_operand.hbm [shape: f32[2,3,16,16], index: 2, kind: input, shape index: {}]   ;;  %s1409_s3 = inlined_call_operand.vmem [shape: f32[16,8], index: 3, kind: input, shape index: {}]   ;;  %s1410_s4 = inlined_call_operand.hbm [shape: f32[2,16,16], index: 4, kind: output, shape index: {0}]   ;;  %s1411_s5 = inlined_call_operand.hbm [shape: f32[2,2,8,8], index: 5, kind: output, shape index: {1}]  }
   0x1   :  { %1420 = sst [smem:[#allocation22_spill]] %s1407_s1 }
   0x2   :  { %1421 = sst [smem:[#allocation23_spill]] %s1411_s5 }
   0x3   :  { %11 = vsyncpa [#allocation3], 0 }
   0x4   :  { %13 = vsyncpa [#allocation3 + $0x1], 0 }
   0x5   :  { %14 = vsyncpa [#allocation6], 0 }
   0x6   :  { %16 = vsyncpa [#allocation6 + $0x1], 0 }
   0x7   :  { %17 = vsyncpa [#allocation4], 0 }
   0x8   :  { %19 = vsyncpa [#allocation4 + $0x1], 0 }
   0x9   :  { %20 = vsyncpa [#allocation10], 0 }
   0xa   :  { %22 = vsyncpa [#allocation10 + $0x1], 0  ;;  %s1188_s18 = smov 0   ;;  %s1190_s19 = smov 0  }
   0xb   :  { %s1192_s20 = smov 0   ;;  %s1194_s21 = smov 0  }
   0xc   :  { %s1196_s22 = smov 0   ;;  %s1198_s23 = smov 0  }
   0xd LB: > { %1422 = sst [smem:[#allocation15_spill]] %s1131_s18  ;;  %s1219_s24 = sadd.s32 4294967295, %s1151_s23   ;;  %s1151_s23 = sphi %s1198_s23, %s28_s23   ;;  %s1147_s22 = sphi %s1196_s22, %s1443_s22   ;;  %s1143_s21 = sphi %s1194_s21, %s1442_s21   ;;  %s1139_s20 = sphi %s1192_s20, %s1441_s20   ;;  %s1135_s19 = sphi %s1190_s19, %s1445_s19   ;;  %s1131_s18 = sphi %s1188_s18, %s1444_s18  }
   0xe   : > { %1423 = sst [smem:[#allocation16_spill]] %s1139_s20  ;;  %s818_s25 = sadd.s32 4294967294, %s1151_s23  }
   0xf   : > { %1424 = sst [smem:[#allocation17_spill]] %s1147_s22  ;;  %s40_s26 = sadd.s32 1, %s1147_s22 }
  0x10   : > { %1425 = sst [smem:[#allocation18_spill]] %s1151_s23  ;;  %s49_s27 = sadd.s32 1, %s1139_s20 }
  0x11   : > { %p42_p0 = scmp.ge.s32.totalorder %s40_s26, 2  ;;  %p56_p1 = scmp.ne.s32.totalorder %s1139_s20, %s1135_s19 }
  0x12   : > { %p57_p2 = scmp.eq.s32.totalorder %s1151_s23, 0  ;;  %p62_p3 = scmp.ne.s32.totalorder %s1135_s19, %s1131_s18 }
  0x13   : > { %s1447_s26 = smov (%p42_p0, %s40_s26), 0  ;;  %p63_p5 = scmp.eq.s32.totalorder %s1219_s24, 0 }
  0x14   : > { %1426 = sst [smem:[#allocation19_spill]] %s1447_s26  ;;  %p1231_p4 = por %p57_p2, %p56_p1 }
  0x15   : > { %s44_s29 = ssub.s32 %s1147_s22, %s1447_s26  ;;  %p165_p6 = scmp.eq.s32.totalorder %s1219_s24, 1 }
  0x16   : > { %p47_p7 = scmp.eq.s32.totalorder %s44_s29, 0  ;;  %p1239_p8 = por %p63_p5, %p62_p3 }
  0x17   : > { %p1243_p9 = por %p165_p6, %p56_p1  ;;  %p171_p10 = scmp.eq.s32.totalorder %s818_s25, 1 }
  0x18   : > { %s1248_s7 = scalar_select %p47_p7, %s1139_s20, %s49_s27  }
  0x19   : > { %p1250_p11 = por %p171_p10, %p62_p3  ;;  %p820_p12 = scmp.ge.s32.totalorder %s1151_s23, 2 }
  0x1a   : > { %1430 = sst [smem:[#allocation20_spill]] %s1248_s7  ;;  %p888_p13 = scmp.lt.s32.totalorder %s1151_s23, 2 }
  0x1b   : > { %s1431_s8 = scalar_select %p1250_p11, 1, 0 }
  0x1c   : > { %s222_s9 = sand.u32 1, %s1139_s20   ;;  %s1260_s11 = smul.u32 48, %s1147_s22 }
  0x1d   : > { %1432 = sst [smem:[#allocation21_spill]] %s1431_s8  ;;  %s1257_s10 = sshll.u32 %s222_s9, 4 }
  0x1e   : > { %p1264_p0 = pnand %p888_p13, %p1231_p4  ;;  %s246_s13 = sand.u32 1, %s1151_s23  }
  0x1f   : > { %s1434_s1 = sld [smem:[#allocation22_spill]]  ;;  %s250_s25 = scalar_lea.vmem [#allocation5], %s1257_s10 }
  0x20   : > { %s261_s27 = sshll.u32 %s250_s25, 4  ;;  %p827_p1 = scmp.ge.s32.totalorder %s1151_s23, 1  ;;  %s262_s27 = int_to_ptr.vmem [resolvable:$true] %s261_s27 }
  0x21   : > { %s247_s28 = scalar_lea.sflag [#allocation6], %s246_s13  ;;  %s1153_s26 = smov 128  }
  0x22   : > { %s1154_s22 = smov 8   ;;  %p294_p2 = scmp.lt.s32.totalorder %s1151_s23, 3 }
  0x23   : > { %s226_s25 = scalar_lea.vmem [#allocation2], %s1257_s10  ;;  %s223_s13 = scalar_lea.sflag [#allocation3], %s222_s9 }
  0x24   : > { %p1278_p3 = pnand %p827_p1, %p294_p2  ;;  %s275_s23 = scalar_lea.vmem [#allocation7], %s1257_s10 }
  0x25   : > { %s703_s16 = scalar_lea.hbm %s1434_s1, %s1260_s11  ;;  %s236_s1 = sshll.u32 %s226_s25, 4  ;;  %s237_s1 = int_to_ptr.vmem [resolvable:$true] %s236_s1 }
  0x26   : > { %s704_s17 = scalar_lea.hbm %s703_s16, 16  ;;  %s286_s8 = sshll.u32 %s275_s23, 4  ;;  %s287_s8 = int_to_ptr.vmem [resolvable:$true] %s286_s8 }
  0x27   : > { %s259_s29 = sshll.u32 %s704_s17, 4  ;;  %s233_s17 = scalar_lea.hbm %s1406_s0, %s1260_s11  ;;  %s260_s29 = int_to_ptr.hbm [resolvable:$true] %s259_s29 }
  0x28   : > { %877 = dma.hbm_to_vmem [thread:$0]  (!%p1264_p0), %s260_s29, 256, %s262_s27, %s247_s28, %s1153_s26, %s1153_s26, %s1154_s22  }
  0x29   : > { %s234_s7 = sshll.u32 %s233_s17, 4  ;;  %s712_s29 = scalar_lea.hbm %s1408_s2, %s1260_s11  ;;  %s235_s7 = int_to_ptr.hbm [resolvable:$true] %s234_s7 }
  0x2a   : > { %874 = dma.hbm_to_vmem [thread:$0]  (!%p1264_p0), %s235_s7, 256, %s237_s1, %s223_s13, %s1153_s26, %s1153_s26, %s1154_s22  }
  0x2b   : > { %s713_s18 = scalar_lea.hbm %s712_s29, 32  ;;  %298 = sbr.rel (%p1278_p3) target bundleno = 219 (0xdb), region = 36 }
  0x2c   : > { %s284_s5 = sshll.u32 %s713_s18, 4  ;;  %s1299_s9 = sand.u32 (!%p1278_p3), 1, %s1135_s19   ;;  %s285_s5 = int_to_ptr.hbm [resolvable:$true] %s284_s5 }
  0x2d   : > { %880 = dma.hbm_to_vmem [thread:$0]  (!%p1264_p0), %s285_s5, 256, %s287_s8, %s247_s28, %s1153_s26, %s1153_s26, %s1154_s22  }
  0x2e   : > { %s1302_s1 = sshll.u32 (!%p1278_p3), %s1299_s9, 4  ;;  %s301_s20 = scalar_lea.sflag (!%p1278_p3), [#allocation3], %s1299_s9 }
  0x2f   : > { %s304_s23 = scalar_lea.vmem (!%p1278_p3), [#allocation2], %s1302_s1 }
  0x30   : > { %1114 = dma.done.wait (%p1239_p8), %s301_s20, 256  }
  0x31   : > { %1116 = vsyncadd (%p1239_p8), %s301_s20, 4294967040  ;;  %s310_s5 = sand.u32 1, %s1219_s24   ;;  %s314_s22 = scalar_lea.vmem [#allocation5], %s1302_s1 }
  0x32   : > { %s311_s18 = scalar_lea.sflag [#allocation6], %s310_s5 }
  0x33   : > { %1118 = dma.done.wait (%p1239_p8), %s311_s18, 512  }
  0x34   : > { %1120 = vsyncadd (%p1239_p8), %s311_s18, 4294966784  ;;  %v503_v0 = vld [vmem:[%s1409_s3 + $0x8] sm:$0xff]  ;;  %v502_v1 = vld [vmem:[%s1409_s3] sm:$0xff]  ;;  %vm387_vm0 = vcmask 130048   ;;  %s324_s24 = scalar_lea.vmem [#allocation7], %s1302_s1  ;;  %s1324_s30 = scalar_lea.vmem [#allocation8], %s1302_s1 }
  0x35   : > { %v371_v2 = vld [vmem:[%s304_s23] sm:$0xff]  ;;  %550 = vmatpush.msra.mxu0 %v503_v0  ;;  %597 = vmatpush.msra.mxu1 %v503_v0  ;;  %v372_v3 = vld [vmem:[%s304_s23 + $0x8] sm:$0xff]  ;;  %vm520_vm1 = vcmask 1041409   ;;  %vm522_vm2 = vcmask 1042434   ;;  %vm524_vm3 = vcmask 1043459   ;;  %vm526_vm4 = vcmask 1044484  }
  0x36   : > { %v373_v4 = vld [vmem:[%s314_s22] sm:$0xff]  ;;  %v374_v5 = vld [vmem:[%s314_s22 + $0x8] sm:$0xff]  ;;  %v377_v6 = vmul.f32 76.244995, %v371_v2  ;;  %v400_v7 = vmul.f32 127.5, %v371_v2  ;;  %v401_v25 = vmul.f32 127.5, %v372_v3 }
  0x37   : > { %v375_v8 = vld [vmem:[%s324_s24] sm:$0xff]  ;;  %v376_v9 = vld [vmem:[%s324_s24 + $0x8] sm:$0xff]  ;;  %v378_v10 = vmul.f32 76.244995, %v372_v3  ;;  %v379_v11 = vmul.f32 149.685, %v373_v4  ;;  %551 = vmatpush.msra.mxu0 %v502_v1  ;;  %598 = vmatpush.msra.mxu1 %v502_v1 }
  0x38   : > { %v380_v12 = vmul.f32 149.685, %v374_v5  ;;  %v383_v13 = vmul.f32 29.07, %v375_v8  ;;  %v384_v14 = vmul.f32 29.07, %v376_v9 }
  0x39   : > { %v381_v15 = vadd.f32 %v379_v11, %v377_v6  ;;  %v390_v16 = vmul.f32 -43.02768, %v371_v2  ;;  %v391_v17 = vmul.f32 -43.02768, %v372_v3  ;;  %v392_v18 = vmul.f32 -84.47232, %v373_v4 }
  0x3a   : > { %v382_v19 = vadd.f32 %v380_v12, %v378_v10  ;;  %v393_v20 = vmul.f32 -84.47232, %v374_v5  ;;  %v396_v21 = vmul.f32 127.5, %v375_v8  ;;  %v397_v22 = vmul.f32 127.5, %v376_v9  ;;  %s625_s11 = sshll.u32 %s1324_s30, 4  ;;  %s859_s12 = sshll.u32 %s1143_s21, 4  ;;  %s626_s11 = int_to_ptr.vmem [resolvable:$true] %s625_s11 }
  0x3b   : > { %v385_v23 = vadd.f32 %v383_v13, %v381_v15  ;;  %v394_v24 = vadd.f32 %v392_v18, %v390_v16  ;;  %v402_v26 = vmul.f32 -106.76544, %v373_v4  ;;  %v403_v29 = vmul.f32 -106.76544, %v374_v5  ;;  %s624_s15 = scalar_lea.hbm %s1410_s4, %s859_s12  ;;  %s606_s17 = scalar_lea.sflag [#allocation4], %s1299_s9 }
  0x3c   : > { %v386_v27 = vadd.f32 %v384_v14, %v382_v19  ;;  %v395_v28 = vadd.f32 %v393_v20, %v391_v17  ;;  %v406_v30 = vmul.f32 -20.73456, %v375_v8  ;;  %v407_v34 = vmul.f32 -20.73456, %v376_v9  ;;  %s627_s16 = sshll.u32 %s624_s15, 4  ;;  %s1053_s20 = scalar_lea.hbm %s1410_s4, 32  ;;  %s628_s16 = int_to_ptr.hbm [resolvable:$true] %s627_s16 }
  0x3d   : > { %388 = vst.msk [vmem:[%s1324_s30] sm:$0xff] %vm387_vm0, %v385_v23  ;;  %v398_v31 = vadd.f32 %v396_v21, %v394_v24  ;;  %v404_v32 = vadd.f32 %v402_v26, %v400_v7  ;;  %v405_v35 = vadd.f32 %v403_v29, %v401_v25  ;;  %vm528_vm5 = vcmask 1045509   ;;  %s1047_s25 = sshra.s32 %s628_s16, 4  ;;  %s1048_s25 = int_to_ptr.hbm [resolvable:$true] %s1047_s25 }
  0x3e   : > { %389 = vst.msk [vmem:[%s1324_s30 + $0x8] sm:$0xff] %vm387_vm0, %v386_v27  ;;  %v399_v33 = vadd.f32 %v397_v22, %v395_v28  ;;  %vm530_vm6 = vcmask 1046534   ;;  %vm532_vm7 = vcmask 1047559   ;;  %s1049_s13 = scalar_lea.hbm %s1048_s25, 16  ;;  %p1054_p7 = scmp.lt.s32.totalorder %s1048_s25, %s1410_s4 }
  0x3f   : > { %v408_v36 = vadd.f32 %v406_v30, %v404_v32  ;;  %v412_v37 = vrot.slane %v398_v31, 2  ;;  %v413_v38 = vrot.slane %v398_v31, 4  ;;  %v414_v39 = vrot.slane %v398_v31, 6  ;;  %p1050_p4 = scmp.ne.s32.totalorder %s1048_s25, %s1049_s13  ;;  %p1055_p8 = scmp.lt.s32.totalorder %s1053_s20, %s1049_s13 }
  0x40   : > { %v415_v40 = vrot.slane %v399_v33, 2  ;;  %v416_v41 = vrot.slane %v399_v33, 4  ;;  %v417_v42 = vrot.slane %v399_v33, 6  ;;  %v833_v43 = vrot.slane %v398_v31, 9 }
  0x41   : > { %v834_v44 = vrot.slane %v412_v37, 9  ;;  %v835_v45 = vrot.slane %v413_v38, 9  ;;  %v836_v46 = vrot.slane %v414_v39, 9  ;;  %v837_v47 = vrot.slane %v399_v33, 9  ;;  %p1051_p5 = pnand %p1050_p4, %p1243_p9  ;;  %p1056_p10 = por %p1055_p8, %p1054_p7 }
  0x42   : > { %v838_v48 = vrot.slane %v415_v40, 9  ;;  %v839_v49 = vrot.slane %v416_v41, 9  ;;  %v840_v50 = vrot.slane %v417_v42, 9  ;;  %v462_v51 = vadd.f32 %v833_v43, %v398_v31 }
  0x43   : > { %v463_v52 = vadd.f32 %v834_v44, %v412_v37  ;;  %v464_v53 = vadd.f32 %v835_v45, %v413_v38  ;;  %v465_v54 = vadd.f32 %v836_v46, %v414_v39  ;;  %v466_v55 = vadd.f32 %v837_v47, %v399_v33  ;;  %p1052_p6 = pneg %p1051_p5 }
  0x44   : > { %v467_v56 = vadd.f32 %v838_v48, %v415_v40  ;;  %v468_v57 = vadd.f32 %v839_v49, %v416_v41  ;;  %v469_v58 = vadd.f32 %v840_v50, %v417_v42  ;;  %v512_v59 = vperm.slane %v462_v51, 0 }
  0x45   : > { %v513_v60 = vperm.slane %v463_v52, 0  ;;  %v514_v61 = vperm.slane %v464_v53, 0  ;;  %v515_v62 = vperm.slane %v465_v54, 0  ;;  %v516_v63 = vperm.slane %v466_v55, 0  ;;  %p1057_p13 = pnand %p1056_p10, %p1052_p6 }
  0x46   : > { %v517_v0 = vperm.slane %v467_v56, 0  ;;  %v518_v1 = vperm.slane %v468_v57, 0  ;;  %v519_v2 = vperm.slane %v469_v58, 0  ;;  %v409_v3 = vadd.f32 %v407_v34, %v405_v35 }
  0x47   : > { %v521_v4 = vsel %vm520_vm1, %v513_v60, %v512_v59  ;;  %v426_v5 = vrot.slane %v408_v36, 2  ;;  %v427_v6 = vrot.slane %v408_v36, 4  ;;  %v428_v7 = vrot.slane %v408_v36, 6 }
  0x48   : > { %v523_v8 = vsel %vm522_vm2, %v514_v61, %v521_v4  ;;  %v429_v9 = vrot.slane %v409_v3, 2  ;;  %v430_v10 = vrot.slane %v409_v3, 4  ;;  %v431_v11 = vrot.slane %v409_v3, 6 }
  0x49   : > { %v525_v12 = vsel %vm524_vm3, %v515_v62, %v523_v8  ;;  %v841_v13 = vrot.slane %v408_v36, 9  ;;  %v842_v14 = vrot.slane %v426_v5, 9  ;;  %v843_v15 = vrot.slane %v427_v6, 9 }
  0x4a   : > { %v527_v16 = vsel %vm526_vm4, %v516_v63, %v525_v12  ;;  %v844_v17 = vrot.slane %v428_v7, 9  ;;  %v845_v18 = vrot.slane %v409_v3, 9  ;;  %v846_v19 = vrot.slane %v429_v9, 9 }
  0x4b   : > { %v529_v20 = vsel %vm528_vm5, %v517_v0, %v527_v16  ;;  %v847_v21 = vrot.slane %v430_v10, 9  ;;  %v848_v22 = vrot.slane %v431_v11, 9  ;;  %v494_v23 = vadd.f32 %v841_v13, %v408_v36 }
  0x4c   : > { %v531_v24 = vsel %vm530_vm6, %v518_v1, %v529_v20  ;;  %v495_v25 = vadd.f32 %v842_v14, %v426_v5  ;;  %v496_v26 = vadd.f32 %v843_v15, %v427_v6  ;;  %v497_v27 = vadd.f32 %v844_v17, %v428_v7 }
  0x4d   : > { %v533_v28 = vsel %vm532_vm7, %v519_v2, %v531_v24  ;;  %v498_v29 = vadd.f32 %v845_v18, %v409_v3  ;;  %v499_v30 = vadd.f32 %v846_v19, %v429_v9  ;;  %v500_v31 = vadd.f32 %v847_v21, %v430_v10 }
  0x4e   : > { %849 = vmatmul.msk.f32.vlgmr.msra.gmra.mxu0 %vm387_vm0, %v533_v28  ;;  %v501_v32 = vadd.f32 %v848_v22, %v431_v11  ;;  %v566_v33 = vperm.slane %v494_v23, 0  ;;  %v567_v34 = vperm.slane %v495_v25, 0  ;;  %v568_v35 = vperm.slane %v496_v26, 0 }
  0x4f   : > { %v569_v37 = vperm.slane %v497_v27, 0  ;;  %v570_v36 = vperm.slane %v498_v29, 0  ;;  %v571_v38 = vperm.slane %v499_v30, 0  ;;  %v572_v40 = vperm.slane %v500_v31, 0 }
  0x50   : > { %v574_v39 = vsel %vm520_vm1, %v567_v34, %v566_v33  ;;  %v573_v42 = vperm.slane %v501_v32, 0 }
  0x51   : > { %v575_v41 = vsel %vm522_vm2, %v568_v35, %v574_v39 }
  0x52   : > { %v576_v43 = vsel %vm524_vm3, %v569_v37, %v575_v41 }
  0x53   : > { %v577_v44 = vsel %vm526_vm4, %v570_v36, %v576_v43 }
  0x54   : > { %v578_v45 = vsel %vm528_vm5, %v571_v38, %v577_v44 }
  0x55   : > { %v579_v46 = vsel %vm530_vm6, %v572_v40, %v578_v45 }
  0x56   : > { %v580_v47 = vsel %vm532_vm7, %v573_v42, %v579_v46 }
  0x57   : > { %850 = vmatmul.msk.f32.vlgmr.msra.gmra.mxu1 %vm387_vm0, %v580_v47 }
  0x58   : > { %1060 = shalt.err (!%p1057_p13)
}
  0x59   : > { %s1155_s18 = smov 128   ;;  %s1156_s22 = smov 8   ;;  %vm556_vm8 = vcmask 64512  }
  0x5a   : > { %867 = dma.vmem_to_hbm [thread:$0]  (%p1243_p9), %s626_s11, 256, %s628_s16, %s606_s17, %s1155_s18, %s1155_s18, %s1156_s22  }
  0x5b   : > { %s856_s26 = sshll.u32 %s1143_s21, 3  ;;  %s366_s7 = scalar_lea.vmem [#allocation9], %s1302_s1 }
  0x5c   : > { %s1436_s24 = sld [smem:[#allocation23_spill]]  ;;  %s642_s12 = sshll.u32 %s366_s7, 4  ;;  %s643_s12 = int_to_ptr.vmem [resolvable:$true] %s642_s12 }
  0x5d   : > { %s611_s14 = scalar_lea.sflag [#allocation10], %s1299_s9 }
  0x62   : > { %s641_s30 = scalar_lea.hbm %s1436_s24, %s856_s26  ;;  %s1081_s16 = scalar_lea.hbm %s1436_s24, 32 }
  0x63   : > { %s644_s28 = sshll.u32 %s641_s30, 4  ;;  %s645_s28 = int_to_ptr.hbm [resolvable:$true] %s644_s28 }
  0x64   : > { %s1075_s11 = sshra.s32 %s645_s28, 4  ;;  %s1076_s11 = int_to_ptr.hbm [resolvable:$true] %s1075_s11 }
  0x65   : > { %s1077_s15 = scalar_lea.hbm %s1076_s11, 16  ;;  %p1082_p3 = scmp.lt.s32.totalorder %s1076_s11, %s1436_s24 }
  0x66   : > { %p1078_p0 = scmp.ne.s32.totalorder %s1076_s11, %s1077_s15  ;;  %p1083_p4 = scmp.lt.s32.totalorder %s1081_s16, %s1077_s15 }
  0x68   : > { %p1079_p1 = pnand %p1078_p0, %p1243_p9  ;;  %p1084_p5 = por %p1083_p4, %p1082_p3 }
  0x6a   : > { %p1080_p2 = pneg %p1079_p1 }
  0x6c   : > { %p1085_p6 = pnand %p1084_p5, %p1080_p2 }
  0xcb   : > { %v553_v48 = vpop.f32.mrf.mxu0 }
  0xcc   : > { %v554_v49 = vadd.f32 128.0, %v553_v48 }
  0xce   : > { %557 = vst.msk [vmem:[%s366_s7] sm:$0xff] %vm556_vm8, %v554_v49 }
  0xd4   : > { %v600_v50 = vpop.f32.mrf.mxu1 }
  0xd5   : > { %v601_v51 = vadd.f32 128.0, %v600_v50 }
  0xd7   : > { %851 = vst.msk [vmem:[%s366_s7 + $0x8] sm:$0xff] %vm556_vm8, %v601_v51 }
  0xd8   : > { %1088 = shalt.err (!%p1085_p6)
}
  0xd9   : > { %s1157_s9 = smov 256  }
  0xda   : > { %868 = dma.vmem_to_hbm [thread:$0]  (%p1243_p9), %s643_s12, 256, %s645_s28, %s611_s14, %s1155_s18, %s1157_s9, %s1156_s22  }
  0xdb PF: > { %s1437_s13 = sld [smem:[#allocation15_spill]]  ;;  %p882_p7 = pnand %p820_p12, %p1250_p11 }
  0xdc   : > { %s1439_s29 = sld [smem:[#allocation18_spill]] }
  0xdd   : > { %p883_p8 = pneg %p882_p7 }
  0xe1   : > { %s659_s20 = sand.u32 1, %s1437_s13  }
  0xe2   : > { %s660_s23 = scalar_lea.sflag [#allocation4], %s659_s20 }
  0xe3   : > { %1122 = dma.done.wait (%p883_p8), %s660_s23, 256  }
  0xe4   : > { %1124 = vsyncadd (%p883_p8), %s660_s23, 4294967040  ;;  %s670_s5 = scalar_lea.sflag [#allocation10], %s659_s20 }
  0xe5   : > { %1126 = dma.done.wait (%p883_p8), %s670_s5, 256  }
  0xe6   : > { %1128 = vsyncadd (%p883_p8), %s670_s5, 4294967040  ;;  %s28_s23 = sadd.s32 1, %s1439_s29   ;;  %s1440_s6 = sld [smem:[#allocation16_spill]] }
  0xe7   : > { %p25_p10 = scmp.ge.s32.totalorder %s28_s23, 4   ;;  %s1441_s20 = sld [smem:[#allocation20_spill]] }
  0xe8   : > { %s1442_s21 = sld [smem:[#allocation17_spill]]  ;;  %s1444_s18 = smov %s1135_s19 }
  0xe9   : > { %s1443_s22 = sld [smem:[#allocation19_spill]]  ;;  %27 = sbr.rel (!%p25_p10) target bundleno = 13 (0xd), region = 123 }
  0xec   : > { %s1445_s19 = smov %s1440_s6 }
  0xee   :  { %676 = vsyncpa [#allocation3], 1 }
  0xef   :  { %678 = vsyncpa [#allocation3 + $0x1], 1 }
  0xf0   :  { %679 = vsyncpa [#allocation6], 1 }
  0xf1   :  { %681 = vsyncpa [#allocation6 + $0x1], 1 }
  0xf2   :  { %682 = vsyncpa [#allocation4], 1 }
  0xf3   :  { %684 = vsyncpa [#allocation4 + $0x1], 1 }
  0xf4   :  { %685 = vsyncpa [#allocation10], 1 }
  0xf5   :  { %687 = vsyncpa [#allocation10 + $0x1], 1 }

</bundles_post_ra>
